<compile_context>
chip_gen: v7x
topology: tpu7x:2x2x1
jax: 0.10.0
libtpu: 0.0.40
codegen_flags: <defaults>
</compile_context>

<pallas_src>
import functools

import jax
import jax.numpy as jnp
from jax.experimental import pallas as pl
from jax.experimental.pallas import tpu as pltpu

_MiB = 1024 * 1024
_LANE = 128


def _round_up(n: int, m: int) -> int:
    return ((n + m - 1) // m) * m


def _sublane_multiple(dtype) -> int:
    """Packed-sublane multiple: 8 for 4-byte, 16 for 2-byte, 32 for 1-byte."""
    itemsize = jnp.dtype(dtype).itemsize
    return max(8, (4 // max(1, itemsize)) * 8)


def _vmem_ceiling_bytes() -> int:
    """Generation-aware VMEM budget, with headroom for Mosaic internal scratch."""
    try:
        phys = int(pltpu.get_tpu_info().vmem_capacity_bytes)
    except Exception:
        phys = 64 * _MiB  # conservative (v7x per-TC size)
    # ~80%: ≈51 MiB on a 64 MiB part (v7x), ≈102 MiB on 128 MiB parts (v5e/v6e).
    return int(phys * 0.80)


# ---------------------------------------------------------------------------
# Kernel: fused 3-layer MLP on one batch tile, weights resident in VMEM.
# ---------------------------------------------------------------------------
def mlp_kernel(x_ref, w1_ref, b1_ref, w2_ref, b2_ref, w3_ref, b3_ref, o_ref):
    x = x_ref[...]  # feed MXU in native dtype; accumulate in f32

    h1 = jnp.dot(x, w1_ref[...], preferred_element_type=jnp.float32) + b1_ref[...]
    h1 = jnp.maximum(h1, 0.0)                      # ReLU

    h2 = jnp.dot(h1.astype(w2_ref.dtype), w2_ref[...],
                 preferred_element_type=jnp.float32) + b2_ref[...]
    h2 = jnp.maximum(h2, 0.0)                      # ReLU

    y = jnp.dot(h2.astype(w3_ref.dtype), w3_ref[...],
                preferred_element_type=jnp.float32) + b3_ref[...]
    o_ref[...] = y.astype(o_ref.dtype)


# ---------------------------------------------------------------------------
# One-time parameter padding (lane-dense feature dims).
# ---------------------------------------------------------------------------
def pad_mlp_params(params):
    """Zero-pad weights/biases to 128-multiple feature dims. Call once at init.

    Returns (padded_params, (d_in, d_hidden, d_out))."""
    w1, b1, w2, b2, w3, b3 = (params["w1"], params["b1"], params["w2"],
                              params["b2"], params["w3"], params["b3"])
    d_in, d_hidden = w1.shape
    d_out = w3.shape[1]
    d_in_p = _round_up(d_in, _LANE)
    d_h_p = _round_up(d_hidden, _LANE)
    d_out_p = _round_up(d_out, _LANE)

    padded = {
        "w1": jnp.pad(w1, ((0, d_in_p - d_in), (0, d_h_p - d_hidden))),
        "b1": jnp.pad(b1.reshape(1, -1), ((0, 0), (0, d_h_p - d_hidden))),
        "w2": jnp.pad(w2, ((0, d_h_p - d_hidden), (0, d_h_p - d_hidden))),
        "b2": jnp.pad(b2.reshape(1, -1), ((0, 0), (0, d_h_p - d_hidden))),
        "w3": jnp.pad(w3, ((0, d_h_p - d_hidden), (0, d_out_p - d_out))),
        "b3": jnp.pad(b3.reshape(1, -1), ((0, 0), (0, d_out_p - d_out))),
    }
    return padded, (d_in, d_hidden, d_out)


# ---------------------------------------------------------------------------
# Forward pass on pre-padded parameters.
# ---------------------------------------------------------------------------
@functools.partial(jax.jit, static_argnames=("d_out", "batch_tile"))
def mlp_forward_padded(x, padded, *, d_out, batch_tile=None):
    w1p, b1p = padded["w1"], padded["b1"]
    w2p, b2p = padded["w2"], padded["b2"]
    w3p, b3p = padded["w3"], padded["b3"]

    B, d_in = x.shape
    d_in_p, d_h_p = w1p.shape
    d_out_p = w3p.shape[1]

    itemsize = jnp.dtype(x.dtype).itemsize
    sub = _sublane_multiple(x.dtype)

    # Pad batch only to the packed-sublane multiple; ragged last tiles are
    # handled by the pl.cdiv grid below (no padding to a tile multiple).
    B_p = _round_up(B, sub)

    # ---- VMEM budget -------------------------------------------------------
    ceiling = _vmem_ceiling_bytes()
    weight_bytes = sum(int(a.size) * a.dtype.itemsize
                       for a in (w1p, b1p, w2p, b2p, w3p, b3p))  # single-buffered

    def tile_bytes(t):
        return (2 * t * d_in_p * itemsize        # x tile, double-buffered
                + 2 * t * d_out_p * itemsize     # out tile, double-buffered
                + 2 * t * d_h_p * 4)             # h1/h2 f32 intermediates

    if weight_bytes + tile_bytes(sub) > ceiling:
        # TODO(synk): hidden-dim-tiled (reduction grid axis + f32 accumulator
        # scratch) Pallas variant for MLPs whose padded weights do not fit
        # resident in VMEM (e.g. f32 hidden >= 4096 on v7x); fall back to XLA.
        h1 = jnp.maximum(jnp.dot(x, w1p[:d_in, :]) + b1p[0], 0.0)
        h2 = jnp.maximum(jnp.dot(h1, w2p) + b2p[0], 0.0)
        return (jnp.dot(h2, w3p) + b3p[0])[:, :d_out]

    # ---- batch tile selection ------------------------------------------------
    if batch_tile is None:
        cap = 1024 if itemsize >= 4 else 2048      # f32 : bf16/int8
        if B_p >= 512:
            # Keep >=2 grid steps so the "parallel" axis can shard across the
            # two TensorCores on v7x (one extra ~0.35us step on 1-TC chips).
            cap = min(cap, _round_up(pl.cdiv(B_p, 2), sub))
        bt = min(B_p, cap)
    else:
        bt = min(B_p, int(batch_tile))
    bt = max(sub, _round_up(bt, sub))
    while bt > sub and weight_bytes + tile_bytes(bt) > ceiling:
        bt = max(sub, _round_up(bt // 2, sub))

    grid = (pl.cdiv(B_p, bt),)

    # ---- pad x only when actually required -----------------------------------
    if (B_p != B) or (d_in_p != d_in):
        xp = jnp.pad(x, ((0, B_p - B), (0, d_in_p - d_in)))
    else:
        xp = x

    needed = weight_bytes + tile_bytes(bt)
    vmem_limit = int(min(ceiling, max(32 * _MiB, int(needed * 1.25))))

    flops = 2 * B_p * (d_in_p * d_h_p + d_h_p * d_h_p + d_h_p * d_out_p)
    bytes_accessed = int(xp.size) * itemsize + B_p * d_out_p * itemsize + weight_bytes

    def x_map(i):
        return (i, 0)

    def rep_map(i):   # weights/biases: same (whole) block for every grid step
        return (0, 0)

    resident = dict(pipeline_mode=pl.Buffered(buffer_count=1))  # constant blocks

    out_p = pl.pallas_call(
        mlp_kernel,
        out_shape=jax.ShapeDtypeStruct((B_p, d_out_p), x.dtype),
        grid_spec=pltpu.PrefetchScalarGridSpec(
            num_scalar_prefetch=0,
            grid=grid,
            in_specs=[
                pl.BlockSpec((bt, d_in_p), x_map),                    # x tile
                pl.BlockSpec((d_in_p, d_h_p), rep_map, **resident),   # W1^T
                pl.BlockSpec((1, d_h_p), rep_map, **resident),        # b1
                pl.BlockSpec((d_h_p, d_h_p), rep_map, **resident),    # W2^T
                pl.BlockSpec((1, d_h_p), rep_map, **resident),        # b2
                pl.BlockSpec((d_h_p, d_out_p), rep_map, **resident),  # W3^T
                pl.BlockSpec((1, d_out_p), rep_map, **resident),      # b3
            ],
            out_specs=pl.BlockSpec((bt, d_out_p), x_map),
        ),
        compiler_params=pltpu.CompilerParams(
            dimension_semantics=("parallel",),
            vmem_limit_bytes=vmem_limit,
        ),
        cost_estimate=pl.CostEstimate(
            flops=flops, transcendentals=0, bytes_accessed=bytes_accessed),
    )(xp, w1p, b1p, w2p, b2p, w3p, b3p)

    if (B_p != B) or (d_out_p != d_out):
        return out_p[:B, :d_out]
    return out_p


def mlp_forward(x, params, *, batch_tile=None):
    """Convenience wrapper that pads params per call.

    Prefer pad_mlp_params() once at init + mlp_forward_padded() for hot loops."""
    padded, (_, _, d_out) = pad_mlp_params(params)
    return mlp_forward_padded(x, padded, d_out=d_out, batch_tile=batch_tile)


# ---------------------------------------------------------------------------
# Parameter init matching the PyTorch module (xavier_uniform weights, 0 bias)
# ---------------------------------------------------------------------------
def xavier_uniform(key, fan_in, fan_out, gain=1.0, dtype=jnp.float32):
    """torch.nn.init.xavier_uniform_ equivalent; returned already transposed
    to [fan_in, fan_out] (PyTorch nn.Linear.weight is [out, in])."""
    limit = gain * (6.0 / (fan_in + fan_out)) ** 0.5
    w = jax.random.uniform(key, (fan_out, fan_in), dtype=dtype,
                           minval=-limit, maxval=limit)
    return w.T


def init_mlp_params(key, inputs_dim, outputs_dim, hidden_dim, dtype=jnp.float32):
    k1, k2, k3 = jax.random.split(key, 3)
    return {
        "w1": xavier_uniform(k1, inputs_dim, hidden_dim, dtype=dtype),
        "b1": jnp.zeros((hidden_dim,), dtype),
        "w2": xavier_uniform(k2, hidden_dim, hidden_dim, dtype=dtype),
        "b2": jnp.zeros((hidden_dim,), dtype),
        "w3": xavier_uniform(k3, hidden_dim, outputs_dim, dtype=dtype),
        "b3": jnp.zeros((outputs_dim,), dtype),
    }


def mlp_reference(x, params):
    h1 = jnp.maximum(x @ params["w1"] + params["b1"], 0.0)
    h2 = jnp.maximum(h1 @ params["w2"] + params["b2"], 0.0)
    return h2 @ params["w3"] + params["b3"]


if __name__ == "__main__":
    key = jax.random.PRNGKey(0)
    k_param, k_x = jax.random.split(key)

    inputs_dim, outputs_dim, hidden_dim = 16, 8, 32
    batch = 16

    params = init_mlp_params(k_param, inputs_dim, outputs_dim, hidden_dim)
    x = jax.random.normal(k_x, (batch, inputs_dim), dtype=jnp.float32)

    # Pad params once (the recommended, allocation-free hot path).
    padded_params, (_, _, d_out) = pad_mlp_params(params)
    padded_params = jax.tree_util.tree_map(jax.block_until_ready, padded_params)

    y = mlp_forward_padded(x, padded_params, d_out=d_out)
    y = jax.block_until_ready(y)

    y_ref = mlp_reference(x, params)
    assert y.shape == (batch, outputs_dim)
    assert jnp.allclose(y, y_ref, atol=1e-5, rtol=1e-5), (
        float(jnp.max(jnp.abs(y - y_ref))))

    print("KERNEL_OK")
</pallas_src>

<mosaic_0001>
module attributes {stable_mosaic.version = 11 : i64} {
  func.func @mlp_kernel(%arg0: i32, %arg1: memref<16x128xf32, #tpu.memory_space<vmem>>, %arg2: memref<128x128xf32, #tpu.memory_space<vmem>>, %arg3: memref<1x128xf32, #tpu.memory_space<vmem>>, %arg4: memref<128x128xf32, #tpu.memory_space<vmem>>, %arg5: memref<1x128xf32, #tpu.memory_space<vmem>>, %arg6: memref<128x128xf32, #tpu.memory_space<vmem>>, %arg7: memref<1x128xf32, #tpu.memory_space<vmem>>, %arg8: memref<16x128xf32, #tpu.memory_space<vmem>>) attributes {dimension_semantics = [#tpu.dimension_semantics<parallel>], iteration_bounds = array<i64: 1>, scalar_prefetch = 0 : i64, scratch_operands = 0 : i64, tpu.core_type = #tpu.core_type<tc>, window_params = [{transform_indices = @transform_0, window_bounds = array<i64: 16, 128>}, {pipeline_mode = #tpu.pipeline_mode<synchronous>, transform_indices = @transform_1, window_bounds = array<i64: 128, 128>}, {pipeline_mode = #tpu.pipeline_mode<synchronous>, transform_indices = @transform_2, window_bounds = array<i64: 1, 128>}, {pipeline_mode = #tpu.pipeline_mode<synchronous>, transform_indices = @transform_3, window_bounds = array<i64: 128, 128>}, {pipeline_mode = #tpu.pipeline_mode<synchronous>, transform_indices = @transform_4, window_bounds = array<i64: 1, 128>}, {pipeline_mode = #tpu.pipeline_mode<synchronous>, transform_indices = @transform_5, window_bounds = array<i64: 128, 128>}, {pipeline_mode = #tpu.pipeline_mode<synchronous>, transform_indices = @transform_6, window_bounds = array<i64: 1, 128>}, {transform_indices = @transform_7, window_bounds = array<i64: 16, 128>}]} {
    %c0 = arith.constant 0 : index
    %c0_0 = arith.constant 0 : index
    %0 = vector.load %arg1[%c0, %c0_0] : memref<16x128xf32, #tpu.memory_space<vmem>>, vector<16x128xf32>
    %c0_1 = arith.constant 0 : index
    %c0_2 = arith.constant 0 : index
    %1 = vector.load %arg2[%c0_1, %c0_2] : memref<128x128xf32, #tpu.memory_space<vmem>>, vector<128x128xf32>
    %cst = arith.constant dense<0.000000e+00> : vector<16x128xf32>
    %2 = tpu.matmul %0, %1, %cst {dimension_numbers = #tpu.dot_dimension_numbers<[1], [0], [0], [1], [0, 0, 1, 1], [], []>} : vector<16x128xf32>, vector<128x128xf32>, vector<16x128xf32> -> vector<16x128xf32>
    %c0_3 = arith.constant 0 : index
    %c0_4 = arith.constant 0 : index
    %3 = vector.load %arg3[%c0_3, %c0_4] : memref<1x128xf32, #tpu.memory_space<vmem>>, vector<1x128xf32>
    %4 = vector.broadcast %3 : vector<1x128xf32> to vector<16x128xf32>
    %5 = arith.addf %2, %4 : vector<16x128xf32>
    %cst_5 = arith.constant 0.000000e+00 : f32
    %6 = vector.broadcast %cst_5 : f32 to vector<16x128xf32>
    %7 = arith.maximumf %5, %6 : vector<16x128xf32>
    %c0_6 = arith.constant 0 : index
    %c0_7 = arith.constant 0 : index
    %8 = vector.load %arg4[%c0_6, %c0_7] : memref<128x128xf32, #tpu.memory_space<vmem>>, vector<128x128xf32>
    %cst_8 = arith.constant dense<0.000000e+00> : vector<16x128xf32>
    %9 = tpu.matmul %7, %8, %cst_8 {dimension_numbers = #tpu.dot_dimension_numbers<[1], [0], [0], [1], [0, 0, 1, 1], [], []>} : vector<16x128xf32>, vector<128x128xf32>, vector<16x128xf32> -> vector<16x128xf32>
    %c0_9 = arith.constant 0 : index
    %c0_10 = arith.constant 0 : index
    %10 = vector.load %arg5[%c0_9, %c0_10] : memref<1x128xf32, #tpu.memory_space<vmem>>, vector<1x128xf32>
    %11 = vector.broadcast %10 : vector<1x128xf32> to vector<16x128xf32>
    %12 = arith.addf %9, %11 : vector<16x128xf32>
    %cst_11 = arith.constant 0.000000e+00 : f32
    %13 = vector.broadcast %cst_11 : f32 to vector<16x128xf32>
    %14 = arith.maximumf %12, %13 : vector<16x128xf32>
    %c0_12 = arith.constant 0 : index
    %c0_13 = arith.constant 0 : index
    %15 = vector.load %arg6[%c0_12, %c0_13] : memref<128x128xf32, #tpu.memory_space<vmem>>, vector<128x128xf32>
    %cst_14 = arith.constant dense<0.000000e+00> : vector<16x128xf32>
    %16 = tpu.matmul %14, %15, %cst_14 {dimension_numbers = #tpu.dot_dimension_numbers<[1], [0], [0], [1], [0, 0, 1, 1], [], []>} : vector<16x128xf32>, vector<128x128xf32>, vector<16x128xf32> -> vector<16x128xf32>
    %c0_15 = arith.constant 0 : index
    %c0_16 = arith.constant 0 : index
    %17 = vector.load %arg7[%c0_15, %c0_16] : memref<1x128xf32, #tpu.memory_space<vmem>>, vector<1x128xf32>
    %18 = vector.broadcast %17 : vector<1x128xf32> to vector<16x128xf32>
    %19 = arith.addf %16, %18 : vector<16x128xf32>
    %c0_17 = arith.constant 0 : index
    %c0_18 = arith.constant 0 : index
    %20 = vector.load %arg8[%c0_17, %c0_18] : memref<16x128xf32, #tpu.memory_space<vmem>>, vector<16x128xf32>
    tpu.vector_store %arg8[%c0_17, %c0_18], %19 {strides = array<i32>} : memref<16x128xf32, #tpu.memory_space<vmem>>, vector<16x128xf32>,
    return
  }
  func.func @transform_0(%arg0: i32) -> (i32, i32) {
    %c0_i32 = arith.constant 0 : i32
    %c0_i32_0 = arith.constant 0 : i32
    return %arg0, %c0_i32 : i32, i32
  }
  func.func @transform_1(%arg0: i32) -> (i32, i32) {
    %c0_i32 = arith.constant 0 : i32
    %c0_i32_0 = arith.constant 0 : i32
    %c0_i32_1 = arith.constant 0 : i32
    return %c0_i32, %c0_i32_0 : i32, i32
  }
  func.func @transform_2(%arg0: i32) -> (i32, i32) {
    %c0_i32 = arith.constant 0 : i32
    %c0_i32_0 = arith.constant 0 : i32
    %c0_i32_1 = arith.constant 0 : i32
    return %c0_i32, %c0_i32_0 : i32, i32
  }
  func.func @transform_3(%arg0: i32) -> (i32, i32) {
    %c0_i32 = arith.constant 0 : i32
    %c0_i32_0 = arith.constant 0 : i32
    %c0_i32_1 = arith.constant 0 : i32
    return %c0_i32, %c0_i32_0 : i32, i32
  }
  func.func @transform_4(%arg0: i32) -> (i32, i32) {
    %c0_i32 = arith.constant 0 : i32
    %c0_i32_0 = arith.constant 0 : i32
    %c0_i32_1 = arith.constant 0 : i32
    return %c0_i32, %c0_i32_0 : i32, i32
  }
  func.func @transform_5(%arg0: i32) -> (i32, i32) {
    %c0_i32 = arith.constant 0 : i32
    %c0_i32_0 = arith.constant 0 : i32
    %c0_i32_1 = arith.constant 0 : i32
    return %c0_i32, %c0_i32_0 : i32, i32
  }
  func.func @transform_6(%arg0: i32) -> (i32, i32) {
    %c0_i32 = arith.constant 0 : i32
    %c0_i32_0 = arith.constant 0 : i32
    %c0_i32_1 = arith.constant 0 : i32
    return %c0_i32, %c0_i32_0 : i32, i32
  }
  func.func @transform_7(%arg0: i32) -> (i32, i32) {
    %c0_i32 = arith.constant 0 : i32
    %c0_i32_0 = arith.constant 0 : i32
    return %arg0, %c0_i32 : i32, i32
  }
}

</mosaic_0001>

<bundles_post_ra>
// kernel: mlp_forward_padded.1
= control target key start
LH: loop header
LB: loop body
LE: loop exit
PB: predicated region body
PF: predicated region fallthrough
CT: control target
= control target key end

     0   :  { %12 = vsyncpa [#allocation3], 0  ;;  %s826_s0 = inlined_call_operand.vmem [shape: f32[16,128], index: 0, kind: input, shape index: {}]   ;;  %s827_s1 = inlined_call_operand.hbm [shape: f32[128,128], index: 1, kind: input, shape index: {}]   ;;  %s828_s2 = inlined_call_operand.vmem [shape: f32[1,128], index: 2, kind: input, shape index: {}]   ;;  %s829_s3 = inlined_call_operand.hbm [shape: f32[128,128], index: 3, kind: input, shape index: {}]   ;;  %s830_s4 = inlined_call_operand.vmem [shape: f32[1,128], index: 4, kind: input, shape index: {}]   ;;  %s831_s5 = inlined_call_operand.hbm [shape: f32[128,128], index: 5, kind: input, shape index: {}]   ;;  %s832_s6 = inlined_call_operand.vmem [shape: f32[1,128], index: 6, kind: input, shape index: {}]   ;;  %s833_s7 = inlined_call_operand.vmem [shape: f32[16,128], index: 7, kind: output, shape index: {}]  }
   0x1   :  { %13 = vsyncpa [#allocation5], 0  ;;  %s708_s24 = smov [#allocation4]   ;;  %s709_s26 = smov [#allocation2]  }
   0x2   :  { %s35_s25 = sshll.u32 %s708_s24, 4  ;;  %s21_s27 = sshll.u32 %s709_s26, 4  ;;  %s36_s25 = int_to_ptr.vmem [resolvable:$true] %s35_s25  ;;  %s753_s27 = int_to_ptr.vmem [resolvable:$true] %s21_s27 }
   0x3   :  { %s638_s30 = scalar_lea.hbm %s829_s3, 2048 }
   0x4   :  { %p639_p0 = scmp.ne.s32.totalorder %s829_s3, %s638_s30  ;;  %p642_p1 = scmp.lt.u32.totalorder %s638_s30, %s829_s3 }
   0x6   :  { %p644_p2 = pnand %p642_p1, %p639_p0 }
   0x8   :  { %647 = shalt.err (!%p644_p2)
}
   0x9   :  { %s648_s12 = scalar_lea.vmem %s36_s25, 2048  ;;  %p653_p4 = scmp.lt.s32.totalorder %s36_s25, %s36_s25 }
   0xa   :  { %p649_p3 = scmp.ne.s32.totalorder %s36_s25, %s648_s12  ;;  %p654_p5 = scmp.lt.s32.totalorder %s648_s12, %s648_s12 }
   0xc   :  { %p655_p6 = por %p654_p5, %p653_p4 }
   0xe   :  { %p656_p7 = pnand %p655_p6, %p649_p3 }
  0x10   :  { %659 = shalt.err (!%p656_p7)
}
  0x11   :  { %s710_s13 = smov 128   ;;  %s711_s14 = smov 8  }
  0x12   :  { %41 = dma.hbm_to_vmem [thread:$0]  %s829_s3, 2048, %s36_s25, [#allocation5], %s710_s13, %s710_s13, %s711_s14  }
  0x13   :  { %s660_s19 = scalar_lea.hbm %s827_s1, 2048 }
  0x14   :  { %p661_p8 = scmp.ne.s32.totalorder %s827_s1, %s660_s19  ;;  %p664_p9 = scmp.lt.u32.totalorder %s660_s19, %s827_s1 }
  0x16   :  { %p666_p10 = pnand %p664_p9, %p661_p8 }
  0x18   :  { %669 = shalt.err (!%p666_p10)
}
  0x19   :  { %s670_s24 = scalar_lea.vmem %s753_s27, 2048  ;;  %p675_p12 = scmp.lt.s32.totalorder %s753_s27, %s753_s27 }
  0x1a   :  { %p671_p11 = scmp.ne.s32.totalorder %s753_s27, %s670_s24  ;;  %p676_p13 = scmp.lt.s32.totalorder %s670_s24, %s670_s24 }
  0x1c   :  { %p677_p0 = por %p676_p13, %p675_p12 }
  0x1e   :  { %p678_p1 = pnand %p677_p0, %p671_p11 }
  0x20   :  { %681 = shalt.err (!%p678_p1)
}
  0x21   :  { %27 = dma.hbm_to_vmem [thread:$0]  %s827_s1, 2048, %s753_s27, [#allocation3], %s710_s13, %s710_s13, %s711_s14  }
  0x22   :  { %s712_s26 = smov [#allocation6]   ;;  %s682_s8 = scalar_lea.hbm %s831_s5, 2048 }
  0x23   :  { %s49_s28 = sshll.u32 %s712_s26, 4  ;;  %p683_p2 = scmp.ne.s32.totalorder %s831_s5, %s682_s8  ;;  %s50_s28 = int_to_ptr.vmem [resolvable:$true] %s49_s28 }
  0x24   :  { %p686_p3 = scmp.lt.u32.totalorder %s682_s8, %s831_s5 }
  0x26   :  { %p688_p4 = pnand %p686_p3, %p683_p2 }
  0x28   :  { %691 = shalt.err (!%p688_p4)
}
  0x29   :  { %s692_s15 = scalar_lea.vmem %s50_s28, 2048  ;;  %p697_p6 = scmp.lt.s32.totalorder %s50_s28, %s50_s28 }
  0x2a   :  { %p693_p5 = scmp.ne.s32.totalorder %s50_s28, %s692_s15  ;;  %p698_p7 = scmp.lt.s32.totalorder %s692_s15, %s692_s15 }
  0x2c   :  { %p699_p8 = por %p698_p7, %p697_p6 }
  0x2e   :  { %p700_p9 = pnand %p699_p8, %p693_p5 }
  0x30   :  { %703 = shalt.err (!%p700_p9)
}
  0x31   :  { %55 = dma.hbm_to_vmem [thread:$0]  %s831_s5, 2048, %s50_s28, [#allocation5], %s710_s13, %s710_s13, %s711_s14  }
  0x32   :  { %704 = dma.done.wait [#allocation3], 2048  }
  0x33   :  { %705 = vsyncadd [#allocation3], 4294965248 }
  0x34   :  { %706 = dma.done.wait [#allocation5], 4096  }
  0x35   :  { %707 = vsyncadd [#allocation5], 4294963200  ;;  %v69_v0 = vld [vmem:[#allocation2] sm:$0xff]  ;;  %v70_v1 = vld [vmem:[#allocation2 + $0x8] sm:$0xff] }
  0x36   :  { %v71_v2 = vld [vmem:[#allocation2 + $0x10] sm:$0xff]  ;;  %v537_v3 = vpack.c.bf16 %v70_v1, %v69_v0  ;;  %v72_v4 = vld [vmem:[#allocation2 + $0x18] sm:$0xff]  ;;  %v73_v6 = vld [vmem:[#allocation2 + $0x20] sm:$0xff] }
  0x37   :  { %v541_v5 = vpack.c.bf16 %v72_v4, %v71_v2  ;;  %v74_v7 = vld [vmem:[#allocation2 + $0x28] sm:$0xff]  ;;  %v75_v9 = vld [vmem:[#allocation2 + $0x30] sm:$0xff]  ;;  %v76_v10 = vld [vmem:[#allocation2 + $0x38] sm:$0xff] }
  0x38   :  { %538 = vmatprep.subr.bf16.mxu0 %v537_v3  ;;  %v545_v8 = vpack.c.bf16 %v74_v7, %v73_v6  ;;  %v67_v11 = vld [vmem:[%s826_s0] sm:$0xff]  ;;  %v170_v13 = vld [vmem:[#allocation4 + $0x8] sm:$0xff]  ;;  %v171_v14 = vld [vmem:[#allocation4 + $0x10] sm:$0xff]  ;;  %v549_v20 = vpack.c.bf16 %v76_v10, %v75_v9 }
  0x39   :  { %540 = vmatpush3.bf16.msra.mxu0 %v537_v3  ;;  %464 = vmatprep.mubr.f32.mxu0 %v67_v11  ;;  %v169_v12 = vld [vmem:[#allocation4] sm:$0xff]  ;;  %v172_v16 = vld [vmem:[#allocation4 + $0x18] sm:$0xff]  ;;  %v174_v19 = vld [vmem:[#allocation4 + $0x28] sm:$0xff] }
  0x3a   :  { %542 = vmatprep.subr.bf16.mxu0 %v541_v5  ;;  %v569_v15 = vpack.c.bf16 %v170_v13, %v169_v12  ;;  %v573_v17 = vpack.c.bf16 %v172_v16, %v171_v14  ;;  %v173_v18 = vld [vmem:[#allocation4 + $0x20] sm:$0xff]  ;;  %v78_v22 = vld [vmem:[#allocation2 + $0x48] sm:$0xff]  ;;  %v175_v24 = vld [vmem:[#allocation4 + $0x30] sm:$0xff] }
  0x3b   :  { %v77_v21 = vld [vmem:[#allocation2 + $0x40] sm:$0xff]  ;;  %v577_v23 = vpack.c.bf16 %v174_v19, %v173_v18  ;;  %v176_v25 = vld [vmem:[#allocation4 + $0x38] sm:$0xff]  ;;  %v79_v27 = vld [vmem:[#allocation2 + $0x50] sm:$0xff] }
  0x3c   :  { %570 = vmatprep.subr.bf16.mxu1 %v569_v15  ;;  %v553_v26 = vpack.c.bf16 %v78_v22, %v77_v21  ;;  %v80_v28 = vld [vmem:[#allocation2 + $0x58] sm:$0xff]  ;;  %v581_v29 = vpack.c.bf16 %v176_v25, %v175_v24  ;;  %v177_v30 = vld [vmem:[#allocation4 + $0x40] sm:$0xff]  ;;  %v178_v31 = vld [vmem:[#allocation4 + $0x48] sm:$0xff] }
  0x3d   :  { %544 = vmatpush3.bf16.msra.mxu0 %v541_v5  ;;  %572 = vmatpush3.bf16.msra.mxu1 %v569_v15  ;;  %v557_v32 = vpack.c.bf16 %v80_v28, %v79_v27  ;;  %v81_v33 = vld [vmem:[#allocation2 + $0x60] sm:$0xff]  ;;  %v82_v34 = vld [vmem:[#allocation2 + $0x68] sm:$0xff]  ;;  %v585_v35 = vpack.c.bf16 %v178_v31, %v177_v30  ;;  %v179_v36 = vld [vmem:[#allocation4 + $0x50] sm:$0xff] }
  0x3e   :  { %546 = vmatprep.subr.bf16.mxu0 %v545_v8  ;;  %574 = vmatprep.subr.bf16.mxu1 %v573_v17  ;;  %v180_v37 = vld [vmem:[#allocation4 + $0x58] sm:$0xff]  ;;  %v561_v38 = vpack.c.bf16 %v82_v34, %v81_v33  ;;  %v83_v39 = vld [vmem:[#allocation2 + $0x70] sm:$0xff]  ;;  %v181_v42 = vld [vmem:[#allocation4 + $0x60] sm:$0xff] }
  0x3f   :  { %v84_v40 = vld [vmem:[#allocation2 + $0x78] sm:$0xff]  ;;  %v589_v41 = vpack.c.bf16 %v180_v37, %v179_v36  ;;  %v182_v43 = vld [vmem:[#allocation4 + $0x68] sm:$0xff]  ;;  %v183_v47 = vld [vmem:[#allocation4 + $0x70] sm:$0xff] }
  0x40   :  { %v565_v44 = vpack.c.bf16 %v84_v40, %v83_v39  ;;  %v593_v45 = vpack.c.bf16 %v182_v43, %v181_v42  ;;  %v68_v46 = vld [vmem:[%s826_s0 + $0x8] sm:$0xff]  ;;  %v184_v48 = vld [vmem:[#allocation4 + $0x78] sm:$0xff]  ;;  %v269_v50 = vld [vmem:[#allocation6] sm:$0xff] }
  0x41   :  { %548 = vmatpush3.bf16.msra.mxu0 %v545_v8  ;;  %576 = vmatpush3.bf16.msra.mxu1 %v573_v17  ;;  %v597_v49 = vpack.c.bf16 %v184_v48, %v183_v47  ;;  %v270_v51 = vld [vmem:[#allocation6 + $0x8] sm:$0xff]  ;;  %v271_v52 = vld [vmem:[#allocation6 + $0x10] sm:$0xff]  ;;  %v272_v54 = vld [vmem:[#allocation6 + $0x18] sm:$0xff] }
  0x42   :  { %550 = vmatprep.subr.bf16.mxu0 %v549_v20  ;;  %578 = vmatprep.subr.bf16.mxu1 %v577_v23  ;;  %v601_v53 = vpack.c.bf16 %v270_v51, %v269_v50  ;;  %v605_v55 = vpack.c.bf16 %v272_v54, %v271_v52  ;;  %v273_v56 = vld [vmem:[#allocation6 + $0x20] sm:$0xff]  ;;  %v274_v57 = vld [vmem:[#allocation6 + $0x28] sm:$0xff]  ;;  %v275_v59 = vld [vmem:[#allocation6 + $0x30] sm:$0xff] }
  0x43   :  { %v609_v58 = vpack.c.bf16 %v274_v57, %v273_v56  ;;  %v276_v60 = vld [vmem:[#allocation6 + $0x38] sm:$0xff]  ;;  %v277_v62 = vld [vmem:[#allocation6 + $0x40] sm:$0xff]  ;;  %v278_v63 = vld [vmem:[#allocation6 + $0x48] sm:$0xff] }
  0x44   :  { %v613_v61 = vpack.c.bf16 %v276_v60, %v275_v59  ;;  %v617_v0 = vpack.c.bf16 %v278_v63, %v277_v62  ;;  %v279_v1 = vld [vmem:[#allocation6 + $0x50] sm:$0xff]  ;;  %v280_v2 = vld [vmem:[#allocation6 + $0x58] sm:$0xff]  ;;  %v281_v4 = vld [vmem:[#allocation6 + $0x60] sm:$0xff] }
  0x45   :  { %552 = vmatpush3.bf16.msra.mxu0 %v549_v20  ;;  %580 = vmatpush3.bf16.msra.mxu1 %v577_v23  ;;  %v621_v3 = vpack.c.bf16 %v280_v2, %v279_v1  ;;  %v282_v5 = vld [vmem:[#allocation6 + $0x68] sm:$0xff]  ;;  %v375_v7 = vld [vmem:[%s828_s2] ss:$0 sm:$0xff]  ;;  %v283_v14 = vld [vmem:[#allocation6 + $0x70] sm:$0xff] }
  0x46   :  { %554 = vmatprep.subr.bf16.mxu0 %v553_v26  ;;  %582 = vmatprep.subr.bf16.mxu1 %v581_v29  ;;  %v625_v6 = vpack.c.bf16 %v282_v5, %v281_v4  ;;  %v284_v15 = vld [vmem:[#allocation6 + $0x78] sm:$0xff]  ;;  %v376_v17 = vld [vmem:[%s830_s4] ss:$0 sm:$0xff] }
  0x47   :  { %v629_v16 = vpack.c.bf16 %v284_v15, %v283_v14  ;;  %v377_v24 = vld [vmem:[%s832_s6] ss:$0 sm:$0xff] }
  0x49   :  { %556 = vmatpush3.bf16.msra.mxu0 %v553_v26  ;;  %584 = vmatpush3.bf16.msra.mxu1 %v581_v29 }
  0x4a   :  { %558 = vmatprep.subr.bf16.mxu0 %v557_v32  ;;  %586 = vmatprep.subr.bf16.mxu1 %v585_v35 }
  0x4d   :  { %560 = vmatpush3.bf16.msra.mxu0 %v557_v32  ;;  %588 = vmatpush3.bf16.msra.mxu1 %v585_v35 }
  0x4e   :  { %562 = vmatprep.subr.bf16.mxu0 %v561_v38  ;;  %590 = vmatprep.subr.bf16.mxu1 %v589_v41 }
  0x51   :  { %564 = vmatpush3.bf16.msra.mxu0 %v561_v38  ;;  %592 = vmatpush3.bf16.msra.mxu1 %v589_v41 }
  0x52   :  { %566 = vmatprep.subr.bf16.mxu0 %v565_v44  ;;  %594 = vmatprep.subr.bf16.mxu1 %v593_v45 }
  0x55   :  { %568 = vmatpush3.bf16.msra.mxu0 %v565_v44  ;;  %596 = vmatpush3.bf16.msra.mxu1 %v593_v45 }
  0x56   :  { %598 = vmatprep.subr.bf16.mxu1 %v597_v49  ;;  %602 = vmatprep.subr.bf16.mxu0 %v601_v53 }
  0x58   :  { %465 = vmatmul.mubr.f32.vlgmr.msra.gmra.mrb[0].mxu0 %v68_v46 }
  0x59   :  { %600 = vmatpush3.bf16.msra.mxu1 %v597_v49  ;;  %604 = vmatpush3.bf16.msra.mxu0 %v601_v53 }
  0x5a   :  { %606 = vmatprep.subr.bf16.mxu0 %v605_v55 }
  0x5d   :  { %608 = vmatpush3.bf16.msra.mxu0 %v605_v55 }
  0x5e   :  { %610 = vmatprep.subr.bf16.mxu0 %v609_v58 }
  0x61   :  { %612 = vmatpush3.bf16.msra.mxu0 %v609_v58 }
  0x62   :  { %614 = vmatprep.subr.bf16.mxu0 %v613_v61 }
  0x65   :  { %616 = vmatpush3.bf16.msra.mxu0 %v613_v61 }
  0x66   :  { %618 = vmatprep.subr.bf16.mxu0 %v617_v0 }
  0x69   :  { %620 = vmatpush3.bf16.msra.mxu0 %v617_v0 }
  0x6a   :  { %622 = vmatprep.subr.bf16.mxu0 %v621_v3 }
  0x6d   :  { %624 = vmatpush3.bf16.msra.mxu0 %v621_v3 }
  0x6e   :  { %626 = vmatprep.subr.bf16.mxu0 %v625_v6 }
  0x71   :  { %628 = vmatpush3.bf16.msra.mxu0 %v625_v6 }
  0x72   :  { %630 = vmatprep.subr.bf16.mxu0 %v629_v16 }
  0x75   :  { %632 = vmatpush3.bf16.msra.mxu0 %v629_v16 }
 0x12b   :  { %v466_v8 = vpop.f32.mrb[0].mxu0 }
 0x12c   :  { %v164_v9 = vadd.f32 %v466_v8, %v375_v7  ;;  %v158_v10 = vpop.f32.mrb[1].mxu0 }
 0x12d   :  { %v159_v11 = vadd.f32 %v375_v7, %v158_v10 }
 0x12e   :  { %v168_v13 = vmax.f32 %v164_v9, 0.0 }
 0x12f   :  { %v167_v12 = vmax.f32 %v159_v11, 0.0 }
 0x131   :  { %499 = vmatprep.mubr.f32.mxu1 %v167_v12 }
 0x132   :  { %500 = vmatmul.mubr.f32.vlgmr.msra.gmra.mrb[0].mxu1 %v168_v13 }
 0x205   :  { %v501_v18 = vpop.f32.mrb[0].mxu1 }
 0x206   :  { %v264_v19 = vadd.f32 %v501_v18, %v376_v17  ;;  %v258_v20 = vpop.f32.mrb[1].mxu1 }
 0x207   :  { %v259_v21 = vadd.f32 %v376_v17, %v258_v20 }
 0x208   :  { %v268_v23 = vmax.f32 %v264_v19, 0.0 }
 0x209   :  { %v267_v22 = vmax.f32 %v259_v21, 0.0 }
 0x20b   :  { %534 = vmatprep.mubr.f32.mxu0 %v267_v22 }
 0x20c   :  { %535 = vmatmul.mubr.f32.vlgmr.msra.gmra.mrb[2].mxu0 %v268_v23 }
 0x2df   :  { %v536_v25 = vpop.f32.mrb[2].mxu0 }
 0x2e0   :  { %v364_v26 = vadd.f32 %v536_v25, %v377_v24  ;;  %v358_v27 = vpop.f32.mrb[3].mxu0 }
 0x2e1   :  { %v359_v28 = vadd.f32 %v377_v24, %v358_v27 }
 0x2e2   :  { %368 = vst [vmem:[%s833_s7 + $0x8] sm:$0xff] %v364_v26 }
 0x2e3   :  { %367 = vst [vmem:[%s833_s7] sm:$0xff] %v359_v28 }
 0x2e4   :  { %373 = vsyncpa [#allocation3], 1 }
 0x2e5   :  { %374 = vsyncpa [#allocation5], 1 }

</bundles_post_ra>
